<compile_context>
chip_gen: v7x
topology: tpu7x:2x2x1
jax: 0.10.0
libtpu: 0.0.40
codegen_flags: <defaults>
</compile_context>

<pallas_src>
import functools

import jax
import jax.numpy as jnp
from jax.experimental import pallas as pl
from jax.experimental.pallas import tpu as pltpu

HIDDEN = 50       # logical hidden size (matches the PyTorch module)
HIDDEN_PAD = 64   # padded hidden size (sublane aligned)
HEAD_PAD = 8      # fused head width: row 0 = mu, row 1 = log_sigma, rest = 0


def _softplus(z):
    # Matches torch.nn.functional.softplus(z, beta=1, threshold=20).
    return jnp.where(z > 20.0, z, jnp.log1p(jnp.exp(jnp.minimum(z, 20.0))))


def _round_up(n, m):
    return ((n + m - 1) // m) * m


def tobit_kernel(x_ref,              # (bb, D)   f32   x tile, natural layout
                 w1t_ref, b1c_ref,   # (64, D) bf16, (64, 1) f32
                 w23t_ref, b23c_ref, # (2, 64, 64) bf16, (2, 64, 1) f32
                 wht_ref, bhc_ref,   # (8, 64) bf16, (8, 1) f32
                 out_ref,            # (2, bb)   f32   row0 = mu, row1 = sigma
                 *, bf16_act):
    # Cast in-kernel (no separate XLA cast/transpose pass over HBM).
    x_bf = x_ref[...].astype(jnp.bfloat16)                       # (bb, D)

    def act(z):  # z: (64, bb) f32 accumulator + bias
        if bf16_act:
            # v6e / v7x: tanh on packed bf16 vregs through the EUP; the bf16
            # result feeds the next MXU op directly (cast folded in).
            return jnp.tanh(z.astype(jnp.bfloat16))
        # v5e: no bf16 VPU/EUP path -> f32 tanh, then cast for the next matmul.
        return jnp.tanh(z).astype(jnp.bfloat16)

    # fc1: (64, D) contracted with (bb, D) along D -> (64, bb); batch on lanes.
    z1 = jax.lax.dot_general(w1t_ref[...], x_bf,
                             (((1,), (1,)), ((), ())),
                             preferred_element_type=jnp.float32) + b1c_ref[...]
    h = act(z1)
    # dropout (eval mode) -> identity
    # TODO(synk): training-mode Bernoulli dropout masking is not implemented.
    h = act(jnp.dot(w23t_ref[0], h, preferred_element_type=jnp.float32)
            + b23c_ref[0])
    # dropout (eval mode) -> identity
    h = act(jnp.dot(w23t_ref[1], h, preferred_element_type=jnp.float32)
            + b23c_ref[1])
    # dropout (eval mode) -> identity

    head = jnp.dot(wht_ref[...], h,
                   preferred_element_type=jnp.float32) + bhc_ref[...]  # (8, bb)

    # Store only the two useful rows; softplus only on the log_sigma row.
    out_ref[0:1, :] = head[0:1, :]
    out_ref[1:2, :] = _softplus(head[1:2, :])


@functools.partial(jax.jit, static_argnames=("block_b", "min_blocks", "bf16_act"))
def tobit_forward(x, params, *, block_b=2048, min_blocks=1, bf16_act=False):
    """Returns (mu, sigma), each of shape (batch,).

    `params` must come from `prepare_params()` (padded / fused / transposed).
    """
    B, D = x.shape
    w1t, b1c, w23t, b23c, wht, bhc = params

    # Batch tile: multiple of 128 (lane-dense output), large by default,
    # capped for small batches, and split so >= min_blocks blocks exist
    # (min_blocks=2 lets v7x spread tiles over both TensorCores).
    bb = max(128, min(_round_up(block_b, 128),
                      _round_up(B, 128),
                      _round_up(pl.cdiv(B, min_blocks), 128)))
    n_blocks = pl.cdiv(B, bb)
    # The last block may be ragged: OOB input rows are garbage columns that are
    # never mixed across the batch (batch is never contracted), and OOB output
    # lanes of the (2, bb) block are dropped by Pallas on writeback.

    def rep(shape):  # replicated (grid-invariant) operand
        n = len(shape)
        return pl.BlockSpec(shape, lambda i, _n=n: (0,) * _n)

    out = pl.pallas_call(
        functools.partial(tobit_kernel, bf16_act=bf16_act),
        grid=(n_blocks,),
        in_specs=[
            pl.BlockSpec((bb, D), lambda i: (i, 0)),   # x tiles over batch
            rep(w1t.shape), rep(b1c.shape),
            rep(w23t.shape), rep(b23c.shape),
            rep(wht.shape), rep(bhc.shape),
        ],
        out_specs=pl.BlockSpec((2, bb), lambda i: (0, i)),
        out_shape=jax.ShapeDtypeStruct((2, B), jnp.float32),
        compiler_params=pltpu.CompilerParams(
            dimension_semantics=("parallel",)),
    )(x, w1t, b1c, w23t, b23c, wht, bhc)

    return out[0], out[1]


def _device_kind():
    try:
        return jax.devices()[0].device_kind.lower()
    except Exception:
        return ""


def default_bf16_act():
    # bf16 VPU/EUP exists on v6e/v7x; keep f32 element-wise math on v5e & older.
    k = _device_kind()
    return ("v6" in k) or ("v7" in k)


def default_min_blocks():
    # v7x has 2 TensorCores per chip; force >= 2 parallel batch blocks there.
    return 2 if "v7" in _device_kind() else 1


def init_raw_params(key, input_dim, init_bias_std):
    """Deterministic init mimicking PyTorch nn.Linear defaults.

    Weights stored as [in, out] (transposed vs. torch's [out, in]).
    log_sigma bias is filled with log(init_bias_std), as in TobitNet.__init__.
    """
    def linear(k, fan_in, fan_out):
        kw, kb = jax.random.split(k)
        bound = 1.0 / jnp.sqrt(fan_in)
        w = jax.random.uniform(kw, (fan_in, fan_out), jnp.float32, -bound, bound)
        b = jax.random.uniform(kb, (1, fan_out), jnp.float32, -bound, bound)
        return w, b

    k1, k2, k3, k4, k5 = jax.random.split(key, 5)
    w1, b1 = linear(k1, input_dim, HIDDEN)
    w2, b2 = linear(k2, HIDDEN, HIDDEN)
    w3, b3 = linear(k3, HIDDEN, HIDDEN)
    wmu, bmu = linear(k4, HIDDEN, 1)
    wls, _ = linear(k5, HIDDEN, 1)
    bls = jnp.full((1, 1), jnp.log(init_bias_std), jnp.float32)
    return (w1, b1, w2, b2, w3, b3, wmu, bmu, wls, bls)


def prepare_params(raw_params):
    """Pad HIDDEN 50->64, fuse the two heads, transpose for [feat, batch] math,
    and cast matmul weights to bf16 (biases stay f32 column vectors)."""
    w1, b1, w2, b2, w3, b3, wmu, bmu, wls, bls = raw_params
    f32, bf16 = jnp.float32, jnp.bfloat16
    D = w1.shape[0]

    def pad_to(a, shape):
        return jnp.pad(a, [(0, s - d) for s, d in zip(shape, a.shape)])

    # Hidden layers: stored transposed so the kernel computes W^T @ x^T.
    w1t = pad_to(w1, (D, HIDDEN_PAD)).T.astype(bf16)              # (64, D)
    w2t = pad_to(w2, (HIDDEN_PAD, HIDDEN_PAD)).T.astype(bf16)     # (64, 64)
    w3t = pad_to(w3, (HIDDEN_PAD, HIDDEN_PAD)).T.astype(bf16)     # (64, 64)
    w23t = jnp.stack([w2t, w3t])                                  # (2, 64, 64)

    b1c = pad_to(b1, (1, HIDDEN_PAD)).T.astype(f32)               # (64, 1)
    b2c = pad_to(b2, (1, HIDDEN_PAD)).T.astype(f32)
    b3c = pad_to(b3, (1, HIDDEN_PAD)).T.astype(f32)
    b23c = jnp.stack([b2c, b3c])                                  # (2, 64, 1)

    # Fused head: row 0 = mu, row 1 = log_sigma, rows 2..7 = zero padding.
    wh = jnp.concatenate([wmu, wls], axis=1)                      # (50, 2)
    wht = pad_to(wh, (HIDDEN_PAD, HEAD_PAD)).T.astype(bf16)       # (8, 64)
    bh = jnp.concatenate([bmu, bls], axis=1)                      # (1, 2)
    bhc = pad_to(bh, (1, HEAD_PAD)).T.astype(f32)                 # (8, 1)

    return (w1t, b1c, w23t, b23c, wht, bhc)


def tobit_forward_ref(x, raw_params):
    """Pure-JAX reference (bf16 matmul operands, f32 accumulation)."""
    w1, b1, w2, b2, w3, b3, wmu, bmu, wls, bls = raw_params
    bf16 = jnp.bfloat16

    def lin(a, w, b):
        return jnp.dot(a.astype(bf16), w.astype(bf16),
                       preferred_element_type=jnp.float32) + b

    h = jnp.tanh(lin(x, w1, b1))
    h = jnp.tanh(lin(h, w2, b2))
    h = jnp.tanh(lin(h, w3, b3))
    mu = lin(h, wmu, bmu)[:, 0]
    z = lin(h, wls, bls)[:, 0]
    return mu, _softplus(z)


if __name__ == "__main__":
    key = jax.random.PRNGKey(0)
    kx, kp = jax.random.split(key)

    batch, input_dim = 200, 24            # exercises the ragged final block
    init_bias_std = 1.5                   # torch version takes a tensor; log at init

    x = jax.random.normal(kx, (batch, input_dim), jnp.float32)
    raw = init_raw_params(kp, input_dim, init_bias_std)
    params = prepare_params(raw)

    mu_ref, sigma_ref = tobit_forward_ref(x, raw)

    bf16_act = default_bf16_act()
    min_blocks = default_min_blocks()

    # Default large tile (single block unless v7x splits it) and a small tile
    # (multi-block grid + ragged final block) to exercise both paths.
    for bb in (2048, 128):
        mu, sigma = tobit_forward(x, params, block_b=bb,
                                  min_blocks=min_blocks, bf16_act=bf16_act)
        jax.block_until_ready((mu, sigma))

        assert mu.shape == (batch,) and sigma.shape == (batch,)
        assert bool(jnp.all(jnp.isfinite(mu))) and bool(jnp.all(jnp.isfinite(sigma)))
        assert bool(jnp.all(sigma > 0.0))
        assert jnp.allclose(mu, mu_ref, atol=2e-2, rtol=2e-2)
        assert jnp.allclose(sigma, sigma_ref, atol=2e-2, rtol=2e-2)

    print("KERNEL_OK")
</pallas_src>

<mosaic_0001>
module attributes {stable_mosaic.version = 11 : i64} {
  func.func @tobit_kernel(%arg0: i32, %arg1: memref<256x24xf32, #tpu.memory_space<vmem>>, %arg2: memref<64x24xbf16, #tpu.memory_space<vmem>>, %arg3: memref<64x1xf32, #tpu.memory_space<vmem>>, %arg4: memref<2x64x64xbf16, #tpu.memory_space<vmem>>, %arg5: memref<2x64x1xf32, #tpu.memory_space<vmem>>, %arg6: memref<8x64xbf16, #tpu.memory_space<vmem>>, %arg7: memref<8x1xf32, #tpu.memory_space<vmem>>, %arg8: memref<2x256xf32, #tpu.memory_space<vmem>>) attributes {dimension_semantics = [#tpu.dimension_semantics<parallel>], iteration_bounds = array<i64: 1>, scalar_prefetch = 0 : i64, scratch_operands = 0 : i64, tpu.core_type = #tpu.core_type<tc>, window_params = [{transform_indices = @transform_0, window_bounds = array<i64: 256, 24>}, {pipeline_mode = #tpu.pipeline_mode<synchronous>, transform_indices = @transform_1, window_bounds = array<i64: 64, 24>}, {pipeline_mode = #tpu.pipeline_mode<synchronous>, transform_indices = @transform_2, window_bounds = array<i64: 64, 1>}, {pipeline_mode = #tpu.pipeline_mode<synchronous>, transform_indices = @transform_3, window_bounds = array<i64: 2, 64, 64>}, {pipeline_mode = #tpu.pipeline_mode<synchronous>, transform_indices = @transform_4, window_bounds = array<i64: 2, 64, 1>}, {pipeline_mode = #tpu.pipeline_mode<synchronous>, transform_indices = @transform_5, window_bounds = array<i64: 8, 64>}, {pipeline_mode = #tpu.pipeline_mode<synchronous>, transform_indices = @transform_6, window_bounds = array<i64: 8, 1>}, {transform_indices = @transform_7, window_bounds = array<i64: 2, 256>}]} {
    %c0 = arith.constant 0 : index
    %c0_0 = arith.constant 0 : index
    %0 = vector.load %arg1[%c0, %c0_0] : memref<256x24xf32, #tpu.memory_space<vmem>>, vector<256x24xf32>
    %1 = arith.truncf %0 : vector<256x24xf32> to vector<256x24xbf16>
    %c0_1 = arith.constant 0 : index
    %c0_2 = arith.constant 0 : index
    %2 = vector.load %arg2[%c0_1, %c0_2] : memref<64x24xbf16, #tpu.memory_space<vmem>>, vector<64x24xbf16>
    %cst = arith.constant dense<0.000000e+00> : vector<64x256xf32>
    %3 = tpu.matmul %2, %1, %cst {dimension_numbers = #tpu.dot_dimension_numbers<[1], [1], [0], [0], [0, 0, 1, 0], [], []>} : vector<64x24xbf16>, vector<256x24xbf16>, vector<64x256xf32> -> vector<64x256xf32>
    %c0_3 = arith.constant 0 : index
    %c0_4 = arith.constant 0 : index
    %4 = vector.load %arg3[%c0_3, %c0_4] : memref<64x1xf32, #tpu.memory_space<vmem>>, vector<64x1xf32>
    %5 = vector.broadcast %4 : vector<64x1xf32> to vector<64x256xf32>
    %6 = arith.addf %3, %5 : vector<64x256xf32>
    %7 = math.tanh %6 : vector<64x256xf32>
    %8 = arith.truncf %7 : vector<64x256xf32> to vector<64x256xbf16>
    %c0_5 = arith.constant 0 : index
    %c0_6 = arith.constant 0 : index
    %c0_7 = arith.constant 0 : index
    %9 = vector.load %arg4[%c0_5, %c0_6, %c0_7] : memref<2x64x64xbf16, #tpu.memory_space<vmem>>, vector<1x64x64xbf16>
    %10 = vector.shape_cast %9 : vector<1x64x64xbf16> to vector<64x64xbf16>
    %cst_8 = arith.constant dense<0.000000e+00> : vector<64x256xf32>
    %11 = tpu.matmul %10, %8, %cst_8 {dimension_numbers = #tpu.dot_dimension_numbers<[1], [0], [0], [1], [0, 0, 1, 1], [], []>} : vector<64x64xbf16>, vector<64x256xbf16>, vector<64x256xf32> -> vector<64x256xf32>
    %c0_9 = arith.constant 0 : index
    %c0_10 = arith.constant 0 : index
    %c0_11 = arith.constant 0 : index
    %12 = vector.load %arg5[%c0_9, %c0_10, %c0_11] : memref<2x64x1xf32, #tpu.memory_space<vmem>>, vector<1x64x1xf32>
    %13 = vector.shape_cast %12 : vector<1x64x1xf32> to vector<64x1xf32>
    %14 = vector.broadcast %13 : vector<64x1xf32> to vector<64x256xf32>
    %15 = arith.addf %11, %14 : vector<64x256xf32>
    %16 = math.tanh %15 : vector<64x256xf32>
    %17 = arith.truncf %16 : vector<64x256xf32> to vector<64x256xbf16>
    %c1 = arith.constant 1 : index
    %c0_12 = arith.constant 0 : index
    %c0_13 = arith.constant 0 : index
    %18 = vector.load %arg4[%c1, %c0_12, %c0_13] : memref<2x64x64xbf16, #tpu.memory_space<vmem>>, vector<1x64x64xbf16>
    %19 = vector.shape_cast %18 : vector<1x64x64xbf16> to vector<64x64xbf16>
    %cst_14 = arith.constant dense<0.000000e+00> : vector<64x256xf32>
    %20 = tpu.matmul %19, %17, %cst_14 {dimension_numbers = #tpu.dot_dimension_numbers<[1], [0], [0], [1], [0, 0, 1, 1], [], []>} : vector<64x64xbf16>, vector<64x256xbf16>, vector<64x256xf32> -> vector<64x256xf32>
    %c1_15 = arith.constant 1 : index
    %c0_16 = arith.constant 0 : index
    %c0_17 = arith.constant 0 : index
    %21 = vector.load %arg5[%c1_15, %c0_16, %c0_17] : memref<2x64x1xf32, #tpu.memory_space<vmem>>, vector<1x64x1xf32>
    %22 = vector.shape_cast %21 : vector<1x64x1xf32> to vector<64x1xf32>
    %23 = vector.broadcast %22 : vector<64x1xf32> to vector<64x256xf32>
    %24 = arith.addf %20, %23 : vector<64x256xf32>
    %25 = math.tanh %24 : vector<64x256xf32>
    %26 = arith.truncf %25 : vector<64x256xf32> to vector<64x256xbf16>
    %c0_18 = arith.constant 0 : index
    %c0_19 = arith.constant 0 : index
    %27 = vector.load %arg6[%c0_18, %c0_19] : memref<8x64xbf16, #tpu.memory_space<vmem>>, vector<8x64xbf16>
    %cst_20 = arith.constant dense<0.000000e+00> : vector<8x256xf32>
    %28 = tpu.matmul %27, %26, %cst_20 {dimension_numbers = #tpu.dot_dimension_numbers<[1], [0], [0], [1], [0, 0, 1, 1], [], []>} : vector<8x64xbf16>, vector<64x256xbf16>, vector<8x256xf32> -> vector<8x256xf32>
    %c0_21 = arith.constant 0 : index
    %c0_22 = arith.constant 0 : index
    %29 = vector.load %arg7[%c0_21, %c0_22] : memref<8x1xf32, #tpu.memory_space<vmem>>, vector<8x1xf32>
    %30 = vector.broadcast %29 : vector<8x1xf32> to vector<8x256xf32>
    %31 = arith.addf %28, %30 : vector<8x256xf32>
    %32 = vector.extract_strided_slice %31 {offsets = [0, 0], sizes = [1, 256], strides = [1, 1]} : vector<8x256xf32> to vector<1x256xf32>
    %c0_23 = arith.constant 0 : index
    %c0_24 = arith.constant 0 : index
    %33 = vector.load %arg8[%c0_23, %c0_24] : memref<2x256xf32, #tpu.memory_space<vmem>>, vector<1x256xf32>
    tpu.vector_store %arg8[%c0_23, %c0_24], %32 {strides = array<i32>} : memref<2x256xf32, #tpu.memory_space<vmem>>, vector<1x256xf32>,
    %34 = vector.extract_strided_slice %31 {offsets = [1, 0], sizes = [1, 256], strides = [1, 1]} : vector<8x256xf32> to vector<1x256xf32>
    %cst_25 = arith.constant 2.000000e+01 : f32
    %35 = vector.broadcast %cst_25 : f32 to vector<1x256xf32>
    %36 = arith.cmpf ogt, %34, %35 : vector<1x256xf32>
    %cst_26 = arith.constant 2.000000e+01 : f32
    %37 = vector.broadcast %cst_26 : f32 to vector<1x256xf32>
    %38 = arith.minimumf %34, %37 : vector<1x256xf32>
    %39 = math.exp %38 : vector<1x256xf32>
    %40 = math.log1p %39 : vector<1x256xf32>
    %41 = arith.select %36, %34, %40 : vector<1x256xi1>, vector<1x256xf32>
    %c1_27 = arith.constant 1 : index
    %c0_28 = arith.constant 0 : index
    %42 = vector.load %arg8[%c1_27, %c0_28] : memref<2x256xf32, #tpu.memory_space<vmem>>, vector<1x256xf32>
    tpu.vector_store %arg8[%c1_27, %c0_28], %41 {strides = array<i32>} : memref<2x256xf32, #tpu.memory_space<vmem>>, vector<1x256xf32>,
    return
  }
  func.func @transform_0(%arg0: i32) -> (i32, i32) {
    %c0_i32 = arith.constant 0 : i32
    %c0_i32_0 = arith.constant 0 : i32
    return %arg0, %c0_i32 : i32, i32
  }
  func.func @transform_1(%arg0: i32) -> (i32, i32) {
    %c0_i32 = arith.constant 0 : i32
    %c0_i32_0 = arith.constant 0 : i32
    %c0_i32_1 = arith.constant 0 : i32
    return %c0_i32, %c0_i32_0 : i32, i32
  }
  func.func @transform_2(%arg0: i32) -> (i32, i32) {
    %c0_i32 = arith.constant 0 : i32
    %c0_i32_0 = arith.constant 0 : i32
    %c0_i32_1 = arith.constant 0 : i32
    return %c0_i32, %c0_i32_0 : i32, i32
  }
  func.func @transform_3(%arg0: i32) -> (i32, i32, i32) {
    %c0_i32 = arith.constant 0 : i32
    %c0_i32_0 = arith.constant 0 : i32
    %c0_i32_1 = arith.constant 0 : i32
    %c0_i32_2 = arith.constant 0 : i32
    return %c0_i32, %c0_i32_0, %c0_i32_1 : i32, i32, i32
  }
  func.func @transform_4(%arg0: i32) -> (i32, i32, i32) {
    %c0_i32 = arith.constant 0 : i32
    %c0_i32_0 = arith.constant 0 : i32
    %c0_i32_1 = arith.constant 0 : i32
    %c0_i32_2 = arith.constant 0 : i32
    return %c0_i32, %c0_i32_0, %c0_i32_1 : i32, i32, i32
  }
  func.func @transform_5(%arg0: i32) -> (i32, i32) {
    %c0_i32 = arith.constant 0 : i32
    %c0_i32_0 = arith.constant 0 : i32
    %c0_i32_1 = arith.constant 0 : i32
    return %c0_i32, %c0_i32_0 : i32, i32
  }
  func.func @transform_6(%arg0: i32) -> (i32, i32) {
    %c0_i32 = arith.constant 0 : i32
    %c0_i32_0 = arith.constant 0 : i32
    %c0_i32_1 = arith.constant 0 : i32
    return %c0_i32, %c0_i32_0 : i32, i32
  }
  func.func @transform_7(%arg0: i32) -> (i32, i32) {
    %c0_i32 = arith.constant 0 : i32
    %c0_i32_0 = arith.constant 0 : i32
    return %c0_i32, %arg0 : i32, i32
  }
}

</mosaic_0001>

<bundles_post_ra>
// kernel: tobit_forward.1
= control target key start
LH: loop header
LB: loop body
LE: loop exit
PB: predicated region body
PF: predicated region fallthrough
CT: control target
= control target key end

     0   :  { %vm151_vm0 = vcmask 195584   ;;  %v1003_v3 = vmov 0   ;;  %vm385_vm1 = vcmask 523264   ;;  %s1317_s0 = inlined_call_operand.vmem [shape: f32[200,24], index: 0, kind: input, shape index: {}]   ;;  %s1318_s1 = inlined_call_operand.vmem [shape: bf16[64,24], index: 1, kind: input, shape index: {}]   ;;  %s1319_s2 = inlined_call_operand.vmem [shape: f32[64,1], index: 2, kind: input, shape index: {}]   ;;  %s1320_s4 = inlined_call_operand.vmem [shape: f32[2,64,1], index: 4, kind: input, shape index: {}]   ;;  %s1321_s6 = inlined_call_operand.vmem [shape: f32[8,1], index: 6, kind: input, shape index: {}]   ;;  %s1322_s3 = inlined_call_operand.vmem [shape: bf16[2,64,64], index: 3, kind: input, shape index: {}]   ;;  %s1323_s5 = inlined_call_operand.vmem [shape: bf16[8,64], index: 5, kind: input, shape index: {}]   ;;  %s1324_s7 = inlined_call_operand.vmem [shape: f32[2,200], index: 7, kind: output, shape index: {}]  }
   0x1   :  { %v43_v0 = vld [vmem:[%s1317_s0 + $0x80] sm:$0xff]  ;;  %v44_v1 = vld [vmem:[%s1317_s0 + $0x88] sm:$0xff]  ;;  %885 = vset.pattern.permute.xlu0 %v1003_v3  ;;  %886 = vset.pattern.permute.xlu1 %v1003_v3  ;;  %v45_v6 = vld [vmem:[%s1317_s0 + $0x90] sm:$0xff] }
   0x2   :  { %v27_v2 = vld [vmem:[%s1317_s0] sm:$0xff]  ;;  %v67_v4 = vpack.c.bf16 %v44_v1, %v43_v0  ;;  %v28_v5 = vld [vmem:[%s1317_s0 + $0x8] sm:$0xff]  ;;  %v46_v7 = vld [vmem:[%s1317_s0 + $0x98] sm:$0xff]  ;;  %430 = vmatprep.mubr.bf16.mxu1 %v1003_v3 }
   0x3   :  { %v59_v8 = vpack.c.bf16 %v28_v5, %v27_v2  ;;  %v68_v9 = vpack.c.bf16 %v46_v7, %v45_v6  ;;  %v29_v10 = vld [vmem:[%s1317_s0 + $0x10] sm:$0xff]  ;;  %v30_v11 = vld [vmem:[%s1317_s0 + $0x18] sm:$0xff]  ;;  %v47_v14 = vld [vmem:[%s1317_s0 + $0xa0] sm:$0xff] }
   0x4   :  { %875 = vmatprep.subr.msk.bf16.mxu0 %vm151_vm0, %v67_v4  ;;  %v60_v13 = vpack.c.bf16 %v30_v11, %v29_v10  ;;  %v48_v15 = vld [vmem:[%s1317_s0 + $0xa8] sm:$0xff]  ;;  %v31_v18 = vld [vmem:[%s1317_s0 + $0x20] sm:$0xff]  ;;  %v49_v23 = vld [vmem:[%s1317_s0 + $0xb0] sm:$0xff] }
   0x5   :  { %v165_v12 = vsel %vm151_vm0, %v59_v8, 0  ;;  %v69_v17 = vpack.c.bf16 %v48_v15, %v47_v14  ;;  %v32_v19 = vld [vmem:[%s1317_s0 + $0x28] sm:$0xff]  ;;  %v1091_v20 = vld [vmem:[%s1318_s1] sm:$0xff]   ;;  %v50_v24 = vld [vmem:[%s1317_s0 + $0xb8] sm:$0xff] }
   0x6   :  { %852 = vmatpush3.bf16.xpose.msra.mxu0 %v165_v12  ;;  %v168_v16 = vsel %vm151_vm0, %v60_v13, 0  ;;  %867 = vmatprep.mubr.msk.bf16.mxu0 %vm151_vm0, %v1091_v20  ;;  %v61_v21 = vpack.c.bf16 %v32_v19, %v31_v18  ;;  %v83_v22 = vld [vmem:[%s1319_s2] sm:$0xff]  ;;  %v85_v25 = vld [vmem:[%s1319_s2 + $0x10] sm:$0xff]  ;;  %v84_v26 = vld [vmem:[%s1319_s2 + $0x8] sm:$0xff]  ;;  %v70_v29 = vpack.c.bf16 %v50_v24, %v49_v23 }
   0x7   :  { %876 = vmatprep.subr.msk.bf16.mxu0 %vm151_vm0, %v68_v9  ;;  %93 = vperm.xlu0 %885, %v83_v22   ;;  %v86_v27 = vld [vmem:[%s1319_s2 + $0x18] sm:$0xff]  ;;  %v33_v30 = vld [vmem:[%s1317_s0 + $0x30] sm:$0xff]  ;;  %v87_v32 = vld [vmem:[%s1319_s2 + $0x20] sm:$0xff] }
   0x8   :  { %103 = vperm.xlu1 %886, %v85_v25   ;;  %v171_v28 = vsel %vm151_vm0, %v61_v21, 0  ;;  %v34_v31 = vld [vmem:[%s1317_s0 + $0x38] sm:$0xff]  ;;  %v88_v33 = vld [vmem:[%s1319_s2 + $0x28] sm:$0xff]  ;;  %v51_v35 = vld [vmem:[%s1317_s0 + $0xc0] sm:$0xff] }
   0x9   :  { %v62_v34 = vpack.c.bf16 %v34_v31, %v33_v30  ;;  %v52_v36 = vld [vmem:[%s1317_s0 + $0xc8] sm:$0xff]  ;;  %v89_v37 = vld [vmem:[%s1319_s2 + $0x30] sm:$0xff]  ;;  %v90_v38 = vld [vmem:[%s1319_s2 + $0x38] sm:$0xff] }
   0xa   :  { %v71_v40 = vpack.c.bf16 %v52_v36, %v51_v35  ;;  %v35_v41 = vld [vmem:[%s1317_s0 + $0x40] sm:$0xff]  ;;  %v36_v42 = vld [vmem:[%s1317_s0 + $0x48] sm:$0xff]  ;;  %v53_v46 = vld [vmem:[%s1317_s0 + $0xd0] sm:$0xff] }
   0xb   :  { %98 = vperm.xlu0 %885, %v84_v26   ;;  %v174_v39 = vsel %vm151_vm0, %v62_v34, 0  ;;  %v317_v43 = vld [vmem:[%s1320_s4] sm:$0xff]  ;;  %v318_v44 = vld [vmem:[%s1320_s4 + $0x8] sm:$0xff]  ;;  %v63_v45 = vpack.c.bf16 %v36_v42, %v35_v41  ;;  %v54_v47 = vld [vmem:[%s1317_s0 + $0xd8] sm:$0xff] }
   0xc   :  { %108 = vperm.xlu1 %886, %v86_v27   ;;  %v319_v48 = vld [vmem:[%s1320_s4 + $0x10] sm:$0xff]  ;;  %v320_v49 = vld [vmem:[%s1320_s4 + $0x18] sm:$0xff]  ;;  %v72_v51 = vpack.c.bf16 %v54_v47, %v53_v46  ;;  %v321_v54 = vld [vmem:[%s1320_s4 + $0x20] sm:$0xff] }
   0xd   :  { %v177_v50 = vsel %vm151_vm0, %v63_v45, 0  ;;  %v37_v52 = vld [vmem:[%s1317_s0 + $0x50] sm:$0xff]  ;;  %v38_v53 = vld [vmem:[%s1317_s0 + $0x58] sm:$0xff]  ;;  %v322_v55 = vld [vmem:[%s1320_s4 + $0x28] sm:$0xff] }
   0xe   :  { %854 = vmatpush3.bf16.xpose.msra.mxu0 %v168_v16  ;;  %v64_v56 = vpack.c.bf16 %v38_v53, %v37_v52  ;;  %v55_v57 = vld [vmem:[%s1317_s0 + $0xe0] sm:$0xff]  ;;  %v56_v58 = vld [vmem:[%s1317_s0 + $0xe8] sm:$0xff]  ;;  %v323_v59 = vld [vmem:[%s1320_s4 + $0x30] sm:$0xff] }
   0xf   :  { %877 = vmatprep.subr.msk.bf16.mxu0 %vm151_vm0, %v69_v17  ;;  %113 = vperm.xlu0 %885, %v87_v32   ;;  %v324_v60 = vld [vmem:[%s1320_s4 + $0x38] sm:$0xff]  ;;  %v73_v62 = vpack.c.bf16 %v56_v58, %v55_v57  ;;  %v39_v63 = vld [vmem:[%s1317_s0 + $0x60] sm:$0xff]  ;;  %v40_v0 = vld [vmem:[%s1317_s0 + $0x68] sm:$0xff] }
  0x10   :  { %118 = vperm.xlu1 %886, %v88_v33   ;;  %v180_v61 = vsel %vm151_vm0, %v64_v56, 0  ;;  %v833_v1 = vld [vmem:[%s1320_s4 + $0x40] sm:$0xff]  ;;  %v834_v2 = vld [vmem:[%s1320_s4 + $0x48] sm:$0xff]  ;;  %v65_v4 = vpack.c.bf16 %v40_v0, %v39_v63  ;;  %v57_v5 = vld [vmem:[%s1317_s0 + $0xf0] sm:$0xff] }
  0x11   :  { %v58_v6 = vld [vmem:[%s1317_s0 + $0xf8] sm:$0xff]  ;;  %v835_v7 = vld [vmem:[%s1320_s4 + $0x50] sm:$0xff]  ;;  %v837_v13 = vld [vmem:[%s1320_s4 + $0x60] sm:$0xff] }
  0x12   :  { %v836_v8 = vld [vmem:[%s1320_s4 + $0x58] sm:$0xff]  ;;  %v183_v9 = vsel %vm151_vm0, %v65_v4, 0  ;;  %v74_v10 = vpack.c.bf16 %v58_v6, %v57_v5  ;;  %v41_v11 = vld [vmem:[%s1317_s0 + $0x70] sm:$0xff]  ;;  %v838_v14 = vld [vmem:[%s1320_s4 + $0x68] sm:$0xff] }
  0x13   :  { %123 = vperm.xlu0 %885, %v89_v37   ;;  %v42_v12 = vld [vmem:[%s1317_s0 + $0x78] sm:$0xff]  ;;  %v839_v16 = vld [vmem:[%s1320_s4 + $0x70] sm:$0xff]  ;;  %v683_v19 = vld [vmem:[%s1321_s6] sm:$0xff] }
  0x14   :  { %128 = vperm.xlu1 %886, %v90_v38   ;;  %v66_v15 = vpack.c.bf16 %v42_v12, %v41_v11  ;;  %v840_v17 = vld [vmem:[%s1320_s4 + $0x78] sm:$0xff]  ;;  %v888_v21 = vld [vmem:[%s1318_s1 + $0x8] sm:$0xff]   ;;  %v889_v22 = vld [vmem:[%s1318_s1 + $0x10] sm:$0xff]  }
  0x15   :  { %v890_v23 = vld [vmem:[%s1318_s1 + $0x18] sm:$0xff]  }
  0x16   :  { %856 = vmatpush3.bf16.xpose.msra.mxu0 %v171_v28  ;;  %v186_v18 = vsel %vm151_vm0, %v66_v15, 0 }
  0x17   :  { %878 = vmatprep.subr.msk.bf16.mxu0 %vm151_vm0, %v70_v29  ;;  %327 = vperm.xlu0 %885, %v317_v43  }
  0x18   :  { %332 = vperm.xlu1 %886, %v318_v44  }
  0x1b   :  { %337 = vperm.xlu0 %885, %v319_v48  }
  0x1c   :  { %342 = vperm.xlu1 %886, %v320_v49  }
  0x1e   :  { %858 = vmatpush3.bf16.xpose.msra.mxu0 %v174_v39 }
  0x1f   :  { %879 = vmatprep.subr.msk.bf16.mxu0 %vm151_vm0, %v71_v40  ;;  %347 = vperm.xlu0 %885, %v321_v54  }
  0x20   :  { %352 = vperm.xlu1 %886, %v322_v55  }
  0x23   :  { %357 = vperm.xlu0 %885, %v323_v59  }
  0x24   :  { %362 = vperm.xlu1 %886, %v324_v60  }
  0x26   :  { %860 = vmatpush3.bf16.xpose.msra.mxu0 %v177_v50 }
  0x27   :  { %880 = vmatprep.subr.msk.bf16.mxu0 %vm151_vm0, %v72_v51  ;;  %515 = vperm.xlu0 %885, %v833_v1  }
  0x28   :  { %520 = vperm.xlu1 %886, %v834_v2  }
  0x2b   :  { %525 = vperm.xlu0 %885, %v835_v7  }
  0x2c   :  { %530 = vperm.xlu1 %886, %v836_v8  }
  0x2e   :  { %862 = vmatpush3.bf16.xpose.msra.mxu0 %v180_v61 }
  0x2f   :  { %881 = vmatprep.subr.msk.bf16.mxu0 %vm151_vm0, %v73_v62  ;;  %535 = vperm.xlu0 %885, %v837_v13  }
  0x30   :  { %540 = vperm.xlu1 %886, %v838_v14  }
  0x33   :  { %545 = vperm.xlu0 %885, %v839_v16  }
  0x34   :  { %550 = vperm.xlu1 %886, %v840_v17  }
  0x36   :  { %864 = vmatpush3.bf16.xpose.msra.mxu0 %v183_v9 }
  0x37   :  { %882 = vmatprep.subr.msk.bf16.mxu0 %vm151_vm0, %v74_v10  ;;  %686 = vperm.xlu0 %885, %v683_v19  }
  0x3e   :  { %866 = vmatpush3.bf16.xpose.msra.mxu0 %v186_v18 }
  0x45   :  { %868 = vmatmul.mubr.msk.bf16.vlgmr.msra.gmra.mrb[0].mxu0 %vm151_vm0, %v1091_v20 }
  0x46   :  { %869 = vmatprep.mubr.msk.bf16.mxu0 %vm151_vm0, %v888_v21 }
  0x4d   :  { %870 = vmatmul.mubr.msk.bf16.gmra.mrb[4].mxu0 %vm151_vm0, %v888_v21 }
  0x4e   :  { %871 = vmatprep.mubr.msk.bf16.mxu0 %vm151_vm0, %v889_v22 }
  0x55   :  { %872 = vmatmul.mubr.msk.bf16.gmra.mrb[8].mxu0 %vm151_vm0, %v889_v22 }
  0x56   :  { %873 = vmatprep.mubr.msk.bf16.mxu0 %vm151_vm0, %v890_v23 }
  0x5d   :  { %874 = vmatmul.mubr.msk.bf16.gmra.mrb[12].mxu0 %vm151_vm0, %v890_v23 }
  0x86   :  { %v94_v20 = vpop.permute.xlu0 %93 }
  0x87   :  { %v104_v32 = vpop.permute.xlu1 %103 }
  0x8a   :  { %v99_v27 = vpop.permute.xlu0 %98 }
  0x8b   :  { %v109_v37 = vpop.permute.xlu1 %108 }
  0x8e   :  { %v114_v47 = vpop.permute.xlu0 %113 }
  0x8f   :  { %v119_v53 = vpop.permute.xlu1 %118 }
  0x92   :  { %v124_v63 = vpop.permute.xlu0 %123 }
  0x93   :  { %v129_v6 = vpop.permute.xlu1 %128 }
 0x118   :  { %v246_v24 = vpop.f32.mrb[0].mxu0 }
 0x119   :  { %v247_v25 = vadd.f32 %v246_v24, %v94_v20  ;;  %v248_v26 = vpop.f32.mrb[1].mxu0  ;;  %v891_v24 = vld [vmem:[%s1322_s3] sm:$0xff]  }
 0x11a   :  { %v249_v28 = vadd.f32 %v248_v26, %v94_v20  ;;  %v250_v29 = vpop.f32.mrb[2].mxu0  ;;  %v893_v26 = vld [vmem:[%s1322_s3 + $0x10] sm:$0xff]  }
 0x11b   :  { %899 = vtanh.f32 %v247_v25  ;;  %v251_v30 = vadd.f32 %v250_v29, %v99_v27  ;;  %v252_v31 = vpop.f32.mrb[3].mxu0  ;;  %v892_v25 = vld [vmem:[%s1322_s3 + $0x8] sm:$0xff]  }
 0x11c   :  { %901 = vtanh.f32 %v249_v28  ;;  %v253_v33 = vadd.f32 %v252_v31, %v99_v27  ;;  %v894_v27 = vld [vmem:[%s1322_s3 + $0x18] sm:$0xff]   ;;  %v328_v28 = vpop.permute.xlu0 %327 }
 0x11d   :  { %903 = vtanh.f32 %v251_v30 }
 0x11e   :  { %905 = vtanh.f32 %v253_v33 }
 0x120   :  { %v256_v34 = vpop.f32.mrb[4].mxu0 }
 0x121   :  { %v257_v35 = vadd.f32 %v256_v34, %v104_v32  ;;  %v258_v36 = vpop.f32.mrb[5].mxu0 }
 0x122   :  { %v259_v38 = vadd.f32 %v258_v36, %v104_v32  ;;  %v260_v39 = vpop.f32.mrb[6].mxu0  ;;  %v333_v32 = vpop.permute.xlu1 %332 }
 0x123   :  { %907 = vtanh.f32 %v257_v35  ;;  %v261_v40 = vadd.f32 %v260_v39, %v109_v37  ;;  %v262_v41 = vpop.f32.mrb[7].mxu0 }
 0x124   :  { %909 = vtanh.f32 %v259_v38  ;;  %v263_v42 = vadd.f32 %v262_v41, %v109_v37  ;;  %v338_v38 = vpop.permute.xlu0 %337 }
 0x125   :  { %v900_v43 = vpop.eup %899  ;;  %911 = vtanh.f32 %v261_v40 }
 0x126   :  { %v902_v44 = vpop.eup %901  ;;  %913 = vtanh.f32 %v263_v42  ;;  %v343_v42 = vpop.permute.xlu1 %342 }
 0x127   :  { %v904_v45 = vpop.eup %903 }
 0x128   :  { %v906_v46 = vpop.eup %905  ;;  %v266_v48 = vpop.f32.mrb[8].mxu0  ;;  %v301_v49 = vpack.c.bf16 %v904_v45, %v900_v43 }
 0x129   :  { %v267_v50 = vadd.f32 %v266_v48, %v114_v47  ;;  %v268_v51 = vpop.f32.mrb[9].mxu0  ;;  %v302_v52 = vpack.c.bf16 %v906_v46, %v902_v44 }
 0x12a   :  { %v269_v54 = vadd.f32 %v268_v51, %v114_v47  ;;  %v270_v55 = vpop.f32.mrb[10].mxu0 }
 0x12b   :  { %915 = vtanh.f32 %v267_v50  ;;  %v271_v56 = vadd.f32 %v270_v55, %v119_v53  ;;  %v272_v57 = vpop.f32.mrb[11].mxu0  ;;  %398 = vmatprep.subr.bf16.mxu1 %v302_v52  ;;  %v348_v52 = vpop.permute.xlu0 %347 }
 0x12c   :  { %917 = vtanh.f32 %v269_v54  ;;  %v273_v58 = vadd.f32 %v272_v57, %v119_v53  ;;  %399 = vmatpush1.bf16.msra.mxu1 %v301_v49 }
 0x12d   :  { %v908_v59 = vpop.eup %907  ;;  %919 = vtanh.f32 %v271_v56 }
 0x12e   :  { %v910_v60 = vpop.eup %909  ;;  %921 = vtanh.f32 %v273_v58  ;;  %v353_v58 = vpop.permute.xlu1 %352 }
 0x12f   :  { %v912_v61 = vpop.eup %911 }
 0x130   :  { %v914_v62 = vpop.eup %913  ;;  %v276_v0 = vpop.f32.mrb[12].mxu0  ;;  %v303_v1 = vpack.c.bf16 %v912_v61, %v908_v59 }
 0x131   :  { %v277_v2 = vadd.f32 %v276_v0, %v124_v63  ;;  %v278_v4 = vpop.f32.mrb[13].mxu0  ;;  %v304_v5 = vpack.c.bf16 %v914_v62, %v910_v60 }
 0x132   :  { %v279_v7 = vadd.f32 %v278_v4, %v124_v63  ;;  %v280_v8 = vpop.f32.mrb[14].mxu0 }
 0x133   :  { %923 = vtanh.f32 %v277_v2  ;;  %v281_v9 = vadd.f32 %v280_v8, %v129_v6  ;;  %v282_v10 = vpop.f32.mrb[15].mxu0  ;;  %400 = vmatprep.subr.bf16.mxu1 %v304_v5  ;;  %v358_v5 = vpop.permute.xlu0 %357 }
 0x134   :  { %925 = vtanh.f32 %v279_v7  ;;  %v283_v11 = vadd.f32 %v282_v10, %v129_v6  ;;  %401 = vmatpush1.bf16.msra.mxu1 %v303_v1 }
 0x135   :  { %v916_v12 = vpop.eup %915  ;;  %927 = vtanh.f32 %v281_v9 }
 0x136   :  { %v918_v13 = vpop.eup %917  ;;  %929 = vtanh.f32 %v283_v11  ;;  %v363_v11 = vpop.permute.xlu1 %362 }
 0x137   :  { %v920_v14 = vpop.eup %919 }
 0x138   :  { %v922_v15 = vpop.eup %921  ;;  %v305_v16 = vpack.c.bf16 %v920_v14, %v916_v12 }
 0x139   :  { %v306_v17 = vpack.c.bf16 %v922_v15, %v918_v13 }
 0x13b   :  { %402 = vmatprep.subr.bf16.mxu1 %v306_v17 }
 0x13c   :  { %403 = vmatpush1.bf16.msra.mxu1 %v305_v16 }
 0x13d   :  { %v924_v18 = vpop.eup %923 }
 0x13e   :  { %v926_v19 = vpop.eup %925 }
 0x13f   :  { %v928_v21 = vpop.eup %927 }
 0x140   :  { %v930_v22 = vpop.eup %929  ;;  %v307_v23 = vpack.c.bf16 %v928_v21, %v924_v18 }
 0x141   :  { %v308_v20 = vpack.c.bf16 %v930_v22, %v926_v19 }
 0x143   :  { %404 = vmatprep.subr.bf16.mxu1 %v308_v20 }
 0x144   :  { %405 = vmatpush1.bf16.msra.mxu1 %v307_v23 }
 0x147   :  { %821 = vmatmul.mubr.msk.bf16.vlgmr.msra.gmra.mrb[0].mxu1 %vm385_vm1, %v891_v24 }
 0x148   :  { %440 = vmatprep.mubr.bf16.mxu1 %v1003_v3 }
 0x14f   :  { %822 = vmatmul.mubr.msk.bf16.gmra.mrb[4].mxu1 %vm385_vm1, %v892_v25 }
 0x150   :  { %450 = vmatprep.mubr.bf16.mxu1 %v1003_v3 }
 0x157   :  { %823 = vmatmul.mubr.msk.bf16.gmra.mrb[8].mxu1 %vm385_vm1, %v893_v26 }
 0x158   :  { %460 = vmatprep.mubr.bf16.mxu1 %v1003_v3 }
 0x15f   :  { %824 = vmatmul.mubr.msk.bf16.gmra.mrb[12].mxu1 %vm385_vm1, %v894_v27 }
 0x160   :  { %617 = vmatprep.mubr.bf16.mxu1 %v1003_v3 }
 0x21a   :  { %v432_v29 = vpop.f32.mrb[0].mxu1 }
 0x21b   :  { %v433_v30 = vadd.f32 %v432_v29, %v328_v28  ;;  %v434_v31 = vpop.f32.mrb[1].mxu1  ;;  %v895_v29 = vld [vmem:[%s1322_s3 + $0x20] sm:$0xff]  }
 0x21c   :  { %v435_v33 = vadd.f32 %v434_v31, %v328_v28  ;;  %v436_v34 = vpop.f32.mrb[2].mxu1  ;;  %v897_v31 = vld [vmem:[%s1322_s3 + $0x30] sm:$0xff]  }
 0x21d   :  { %931 = vtanh.f32 %v433_v30  ;;  %v437_v35 = vadd.f32 %v436_v34, %v333_v32  ;;  %v438_v36 = vpop.f32.mrb[3].mxu1  ;;  %v896_v30 = vld [vmem:[%s1322_s3 + $0x28] sm:$0xff]  }
 0x21e   :  { %933 = vtanh.f32 %v435_v33  ;;  %v439_v37 = vadd.f32 %v438_v36, %v333_v32  ;;  %v898_v32 = vld [vmem:[%s1322_s3 + $0x38] sm:$0xff]   ;;  %v516_v33 = vpop.permute.xlu0 %515 }
 0x21f   :  { %935 = vtanh.f32 %v437_v35 }
 0x220   :  { %937 = vtanh.f32 %v439_v37  ;;  %v521_v37 = vpop.permute.xlu1 %520 }
 0x222   :  { %v442_v39 = vpop.f32.mrb[4].mxu1 }
 0x223   :  { %v443_v40 = vadd.f32 %v442_v39, %v338_v38  ;;  %v444_v41 = vpop.f32.mrb[5].mxu1 }
 0x224   :  { %v445_v43 = vadd.f32 %v444_v41, %v338_v38  ;;  %v446_v44 = vpop.f32.mrb[6].mxu1 }
 0x225   :  { %939 = vtanh.f32 %v443_v40  ;;  %v447_v45 = vadd.f32 %v446_v44, %v343_v42  ;;  %v448_v46 = vpop.f32.mrb[7].mxu1 }
 0x226   :  { %941 = vtanh.f32 %v445_v43  ;;  %v449_v47 = vadd.f32 %v448_v46, %v343_v42  ;;  %v526_v43 = vpop.permute.xlu0 %525 }
 0x227   :  { %v932_v48 = vpop.eup %931  ;;  %943 = vtanh.f32 %v447_v45 }
 0x228   :  { %v934_v49 = vpop.eup %933  ;;  %945 = vtanh.f32 %v449_v47  ;;  %v531_v47 = vpop.permute.xlu1 %530 }
 0x229   :  { %v936_v50 = vpop.eup %935 }
 0x22a   :  { %v938_v51 = vpop.eup %937  ;;  %v452_v53 = vpop.f32.mrb[8].mxu1  ;;  %v487_v54 = vpack.c.bf16 %v936_v50, %v932_v48 }
 0x22b   :  { %v453_v55 = vadd.f32 %v452_v53, %v348_v52  ;;  %v454_v56 = vpop.f32.mrb[9].mxu1  ;;  %v488_v57 = vpack.c.bf16 %v938_v51, %v934_v49 }
 0x22c   :  { %v455_v59 = vadd.f32 %v454_v56, %v348_v52  ;;  %v456_v60 = vpop.f32.mrb[10].mxu1  ;;  %v536_v56 = vpop.permute.xlu0 %535 }
 0x22d   :  { %947 = vtanh.f32 %v453_v55  ;;  %v457_v61 = vadd.f32 %v456_v60, %v353_v58  ;;  %v458_v62 = vpop.f32.mrb[11].mxu1  ;;  %585 = vmatprep.subr.bf16.mxu1 %v488_v57 }
 0x22e   :  { %949 = vtanh.f32 %v455_v59  ;;  %v459_v63 = vadd.f32 %v458_v62, %v353_v58  ;;  %586 = vmatpush1.bf16.msra.mxu1 %v487_v54  ;;  %v541_v62 = vpop.permute.xlu1 %540 }
 0x22f   :  { %v940_v0 = vpop.eup %939  ;;  %951 = vtanh.f32 %v457_v61 }
 0x230   :  { %v942_v1 = vpop.eup %941  ;;  %953 = vtanh.f32 %v459_v63 }
 0x231   :  { %v944_v2 = vpop.eup %943 }
 0x232   :  { %v946_v4 = vpop.eup %945  ;;  %v462_v6 = vpop.f32.mrb[12].mxu1  ;;  %v489_v7 = vpack.c.bf16 %v944_v2, %v940_v0 }
 0x233   :  { %v463_v8 = vadd.f32 %v462_v6, %v358_v5  ;;  %v464_v9 = vpop.f32.mrb[13].mxu1  ;;  %v490_v10 = vpack.c.bf16 %v946_v4, %v942_v1 }
 0x234   :  { %v465_v12 = vadd.f32 %v464_v9, %v358_v5  ;;  %v466_v13 = vpop.f32.mrb[14].mxu1  ;;  %v546_v9 = vpop.permute.xlu0 %545 }
 0x235   :  { %955 = vtanh.f32 %v463_v8  ;;  %v467_v14 = vadd.f32 %v466_v13, %v363_v11  ;;  %v468_v15 = vpop.f32.mrb[15].mxu1  ;;  %587 = vmatprep.subr.bf16.mxu1 %v490_v10 }
 0x236   :  { %957 = vtanh.f32 %v465_v12  ;;  %v469_v16 = vadd.f32 %v468_v15, %v363_v11  ;;  %588 = vmatpush1.bf16.msra.mxu1 %v489_v7  ;;  %v551_v15 = vpop.permute.xlu1 %550 }
 0x237   :  { %v948_v17 = vpop.eup %947  ;;  %959 = vtanh.f32 %v467_v14 }
 0x238   :  { %v950_v18 = vpop.eup %949  ;;  %961 = vtanh.f32 %v469_v16 }
 0x239   :  { %v952_v19 = vpop.eup %951 }
 0x23a   :  { %v954_v21 = vpop.eup %953  ;;  %v491_v22 = vpack.c.bf16 %v952_v19, %v948_v17 }
 0x23b   :  { %v492_v23 = vpack.c.bf16 %v954_v21, %v950_v18 }
 0x23d   :  { %589 = vmatprep.subr.bf16.mxu1 %v492_v23 }
 0x23e   :  { %590 = vmatpush1.bf16.msra.mxu1 %v491_v22 }
 0x23f   :  { %v956_v20 = vpop.eup %955 }
 0x240   :  { %v958_v24 = vpop.eup %957 }
 0x241   :  { %v960_v25 = vpop.eup %959 }
 0x242   :  { %v962_v26 = vpop.eup %961  ;;  %v493_v27 = vpack.c.bf16 %v960_v25, %v956_v20 }
 0x243   :  { %v494_v28 = vpack.c.bf16 %v962_v26, %v958_v24 }
 0x245   :  { %591 = vmatprep.subr.bf16.mxu1 %v494_v28 }
 0x246   :  { %592 = vmatpush1.bf16.msra.mxu1 %v493_v27 }
 0x249   :  { %845 = vmatmul.mubr.msk.bf16.vlgmr.msra.gmra.mrb[16].mxu1 %vm385_vm1, %v895_v29 }
 0x24a   :  { %627 = vmatprep.mubr.bf16.mxu1 %v1003_v3 }
 0x251   :  { %846 = vmatmul.mubr.msk.bf16.gmra.mrb[20].mxu1 %vm385_vm1, %v896_v30 }
 0x252   :  { %637 = vmatprep.mubr.bf16.mxu1 %v1003_v3 }
 0x259   :  { %847 = vmatmul.mubr.msk.bf16.gmra.mrb[24].mxu1 %vm385_vm1, %v897_v31 }
 0x25a   :  { %647 = vmatprep.mubr.bf16.mxu1 %v1003_v3 }
 0x261   :  { %848 = vmatmul.mubr.msk.bf16.gmra.mrb[28].mxu1 %vm385_vm1, %v898_v32 }
 0x262   :  { %724 = vmatprep.mubr.bf16.mxu1 %v1003_v3 }
 0x31c   :  { %v619_v34 = vpop.f32.mrb[16].mxu1 }
 0x31d   :  { %v620_v35 = vadd.f32 %v619_v34, %v516_v33  ;;  %v621_v36 = vpop.f32.mrb[17].mxu1  ;;  %v1004_v34 = vmov 1966171168  }
 0x31e   :  { %v622_v38 = vadd.f32 %v621_v36, %v516_v33  ;;  %v623_v39 = vpop.f32.mrb[18].mxu1  ;;  %v682_v33 = vld [vmem:[%s1323_s5] sm:$0xf]  ;;  %v739_v36 = vlaneseq }
 0x31f   :  { %963 = vtanh.f32 %v620_v35  ;;  %v624_v40 = vadd.f32 %v623_v39, %v521_v37  ;;  %v625_v41 = vpop.f32.mrb[19].mxu1  ;;  %v737_v35 = vunpack.c.l.s4 %v1004_v34  ;;  %v687_v39 = vpop.permute.xlu0 %686 }
 0x320   :  { %965 = vtanh.f32 %v622_v38  ;;  %v626_v42 = vadd.f32 %v625_v41, %v521_v37  ;;  %v740_v38 = vshrl.u32 %v739_v36, 7  ;;  %vm1303_vm2 = vcmp.lt.s32.totalorder %v739_v36, 256 }
 0x321   :  { %967 = vtanh.f32 %v624_v40  ;;  %v738_v37 = vunpack.c.0.s8 %v737_v35 }
 0x322   :  { %969 = vtanh.f32 %v626_v42 }
 0x324   :  { %v629_v44 = vpop.f32.mrb[20].mxu1 }
 0x325   :  { %v630_v45 = vadd.f32 %v629_v44, %v526_v43  ;;  %v631_v46 = vpop.f32.mrb[21].mxu1  ;;  %v741_v44 = vsub.s32 %v738_v37, %v740_v38 }
 0x326   :  { %v632_v3 = vadd.f32 %v631_v46, %v526_v43  ;;  %v633_v48 = vpop.f32.mrb[22].mxu1 }
 0x327   :  { %971 = vtanh.f32 %v630_v45  ;;  %v634_v49 = vadd.f32 %v633_v48, %v531_v47  ;;  %v635_v50 = vpop.f32.mrb[23].mxu1 }
 0x328   :  { %973 = vtanh.f32 %v632_v3  ;;  %v636_v51 = vadd.f32 %v635_v50, %v531_v47 }
 0x329   :  { %v964_v52 = vpop.eup %963  ;;  %975 = vtanh.f32 %v634_v49 }
 0x32a   :  { %v966_v53 = vpop.eup %965  ;;  %977 = vtanh.f32 %v636_v51 }
 0x32b   :  { %v968_v54 = vpop.eup %967 }
 0x32c   :  { %v970_v55 = vpop.eup %969  ;;  %v639_v57 = vpop.f32.mrb[24].mxu1  ;;  %v674_v58 = vpack.c.bf16 %v968_v54, %v964_v52 }
 0x32d   :  { %v640_v59 = vadd.f32 %v639_v57, %v536_v56  ;;  %v641_v60 = vpop.f32.mrb[25].mxu1  ;;  %v675_v61 = vpack.c.bf16 %v970_v55, %v966_v53 }
 0x32e   :  { %v642_v63 = vadd.f32 %v641_v60, %v536_v56  ;;  %v643_v0 = vpop.f32.mrb[26].mxu1 }
 0x32f   :  { %979 = vtanh.f32 %v640_v59  ;;  %v644_v1 = vadd.f32 %v643_v0, %v541_v62  ;;  %v645_v2 = vpop.f32.mrb[27].mxu1  ;;  %692 = vmatprep.subr.bf16.mxu1 %v675_v61 }
 0x330   :  { %981 = vtanh.f32 %v642_v63  ;;  %v646_v4 = vadd.f32 %v645_v2, %v541_v62  ;;  %693 = vmatpush1.bf16.msra.mxu1 %v674_v58 }
 0x331   :  { %v972_v5 = vpop.eup %971  ;;  %983 = vtanh.f32 %v644_v1 }
 0x332   :  { %v974_v6 = vpop.eup %973  ;;  %985 = vtanh.f32 %v646_v4 }
 0x333   :  { %v976_v7 = vpop.eup %975 }
 0x334   :  { %v978_v8 = vpop.eup %977  ;;  %v649_v10 = vpop.f32.mrb[28].mxu1  ;;  %v676_v11 = vpack.c.bf16 %v976_v7, %v972_v5 }
 0x335   :  { %v650_v12 = vadd.f32 %v649_v10, %v546_v9  ;;  %v651_v13 = vpop.f32.mrb[29].mxu1  ;;  %v677_v14 = vpack.c.bf16 %v978_v8, %v974_v6 }
 0x336   :  { %v652_v16 = vadd.f32 %v651_v13, %v546_v9  ;;  %v653_v17 = vpop.f32.mrb[30].mxu1 }
 0x337   :  { %987 = vtanh.f32 %v650_v12  ;;  %v654_v18 = vadd.f32 %v653_v17, %v551_v15  ;;  %v655_v19 = vpop.f32.mrb[31].mxu1  ;;  %694 = vmatprep.subr.bf16.mxu1 %v677_v14 }
 0x338   :  { %989 = vtanh.f32 %v652_v16  ;;  %v656_v21 = vadd.f32 %v655_v19, %v551_v15  ;;  %695 = vmatpush1.bf16.msra.mxu1 %v676_v11 }
 0x339   :  { %v980_v22 = vpop.eup %979  ;;  %991 = vtanh.f32 %v654_v18 }
 0x33a   :  { %v982_v23 = vpop.eup %981  ;;  %993 = vtanh.f32 %v656_v21 }
 0x33b   :  { %v984_v20 = vpop.eup %983 }
 0x33c   :  { %v986_v24 = vpop.eup %985  ;;  %v678_v25 = vpack.c.bf16 %v984_v20, %v980_v22 }
 0x33d   :  { %v679_v26 = vpack.c.bf16 %v986_v24, %v982_v23 }
 0x33f   :  { %696 = vmatprep.subr.bf16.mxu1 %v679_v26 }
 0x340   :  { %697 = vmatpush1.bf16.msra.mxu1 %v678_v25 }
 0x341   :  { %v988_v27 = vpop.eup %987 }
 0x342   :  { %v990_v28 = vpop.eup %989 }
 0x343   :  { %v992_v29 = vpop.eup %991 }
 0x344   :  { %v994_v30 = vpop.eup %993  ;;  %v680_v31 = vpack.c.bf16 %v992_v29, %v988_v27 }
 0x345   :  { %v681_v32 = vpack.c.bf16 %v994_v30, %v990_v28 }
 0x347   :  { %698 = vmatprep.subr.bf16.mxu1 %v681_v32 }
 0x348   :  { %699 = vmatpush1.bf16.msra.mxu1 %v680_v31 }
 0x34b   :  { %849 = vmatmul.mubr.msk.bf16.vlgmr.msra.gmra.mrb[32].mxu1 %vm385_vm1, %v682_v33 }
 0x41e   :  { %v726_v40 = vpop.f32.mrb[32].mxu1 }
 0x41f   :  { %v727_v41 = vadd.f32 %v726_v40, %v687_v39  ;;  %v728_v42 = vpop.f32.mrb[33].mxu1 }
 0x420   :  { %v729_v43 = vadd.f32 %v728_v42, %v687_v39  ;;  %v730_v45 = vpop.f32.mrb[34].mxu1 }
 0x421   :  { %v758_v46 = vmin.f32 %v727_v41, 20.0  ;;  %v731_v47 = vpop.f32.mrb[35].mxu1  ;;  %vm756_vm4 = vcmp.gt.f32.partialorder %v727_v41, 20.0 }
 0x422   :  { %v735_v3 = vcombine.low %v727_v41, %v729_v43  ;;  %v759_v48 = vmin.f32 %v729_v43, 20.0  ;;  %vm757_vm6 = vcmp.gt.f32.partialorder %v729_v43, 20.0 }
 0x423   :  { %v760_v49 = vmul.f32 1.442695, %v758_v46 }
 0x424   :  { %v742_v50 = vrot.slane %v735_v3, %v741_v44  ;;  %v762_v51 = vmul.f32 1.442695, %v759_v48 }
 0x425   :  { %995 = vpow2.f32 %v760_v49 }
 0x426   :  { %v749_v53 = vrot.slane %v742_v50, %v741_v44  ;;  %997 = vpow2.f32 %v762_v51 }
 0x428   :  { %755 = vst.msk [vmem:[%s1324_s7] ss:$2 sm:$0x3] %vm1303_vm2, %v749_v53 }
 0x42f   :  { %v996_v54 = vpop.eup %995 }
 0x430   :  { %v998_v55 = vpop.eup %997  ;;  %v764_v56 = vadd.f32 1.0, %v996_v54  ;;  %v767_v58 = vmul.f32 -0.5, %v996_v54  ;;  %v770_v61 = vand.u32 2147483647, %v996_v54 }
 0x431   :  { %v773_v57 = vadd.f32 1.0, %v998_v55  ;;  %v776_v59 = vmul.f32 -0.5, %v998_v55  ;;  %v779_v63 = vand.u32 2147483647, %v998_v55 }
 0x432   :  { %999 = vlog2.f32 %v764_v56  ;;  %v768_v60 = vadd.f32 1.0, %v767_v58  ;;  %vm771_vm3 = vcmp.lt.f32.partialorder %v770_v61, 0.0004427343 }
 0x433   :  { %1001 = vlog2.f32 %v773_v57  ;;  %v777_v62 = vadd.f32 1.0, %v776_v59  ;;  %vm780_vm5 = vcmp.lt.f32.partialorder %v779_v63, 0.0004427343 }
 0x434   :  { %v769_v4 = vmul.f32 %v996_v54, %v768_v60 }
 0x435   :  { %v778_v6 = vmul.f32 %v998_v55, %v777_v62 }
 0x43c   :  { %v1000_v0 = vpop.eup %999 }
 0x43d   :  { %v1002_v1 = vpop.eup %1001  ;;  %v766_v2 = vmul.f32 0.6931472, %v1000_v0 }
 0x43e   :  { %v775_v5 = vmul.f32 0.6931472, %v1002_v1 }
 0x43f   :  { %v772_v7 = vsel %vm771_vm3, %v769_v4, %v766_v2 }
 0x440   :  { %v782_v8 = vsel %vm756_vm4, %v727_v41, %v772_v7  ;;  %v781_v9 = vsel %vm780_vm5, %v778_v6, %v775_v5 }
 0x441   :  { %v783_v10 = vsel %vm757_vm6, %v729_v43, %v781_v9 }
 0x442   :  { %v786_v11 = vcombine.low %v782_v8, %v783_v10 }
 0x444   :  { %v793_v12 = vrot.slane %v786_v11, %v741_v44 }
 0x446   :  { %v794_v13 = vcombine.high %v793_v12, %v793_v12 }
 0x448   :  { %v801_v14 = vrot.slane %v794_v13, %v741_v44 }
 0x44a   :  { %850 = vst.msk [vmem:[%s1324_s7 + $0x1] ss:$2 sm:$0x3] %vm1303_vm2, %v801_v14 }

</bundles_post_ra>
